<compile_context>
chip_gen: v5e
topology: v5e:2x2
jax: 0.10.0
libtpu: 0.0.40
codegen_flags: <defaults>
</compile_context>

<pallas_src>
import functools
import math

import jax
import jax.numpy as jnp
from jax.experimental import pallas as pl
from jax.experimental.pallas import tpu as pltpu

SQRT_2 = math.sqrt(2.0)
INV_SQRT_2 = 1.0 / SQRT_2


def _householder_kernel(xy_ref, trig_ref, out_ref, *, ch_tile, single_c_block):
    # xy_ref / out_ref block: (1, 2, ch_tile, lane_tile)
    # trig_ref: full (c_eff_pad, 4) float32 table, resident in VMEM across the grid.
    if single_c_block:
        trig = trig_ref[...]                                      # (ch_tile, 4)
    else:
        off = pl.multiple_of(pl.program_id(1) * ch_tile, ch_tile)
        trig = trig_ref[pl.ds(off, ch_tile), :]                   # (ch_tile, 4)

    sin_half = trig[:, 0:1]   # (ch_tile, 1) f32 -> broadcasts over lanes
    cos_half = trig[:, 1:2]
    sin_th = trig[:, 2:3]
    cos_th = trig[:, 3:4]

    x = xy_ref[0, 0, :, :]    # (ch_tile, lane_tile)
    y = xy_ref[0, 1, :, :]

    selector = x * sin_half - y * cos_half
    keep = selector <= 0.0

    a = jnp.where(keep, x, x * cos_th + y * sin_th)
    b = jnp.where(keep, y, x * sin_th - y * cos_th)

    out_dtype = out_ref.dtype
    out_ref[0, 0, :, :] = (a * INV_SQRT_2).astype(out_dtype)
    out_ref[0, 1, :, :] = (b * INV_SQRT_2).astype(out_dtype)


def _choose_tiles(n, c_eff, lanes, itemsize, target_block_bytes):
    """Pick (ch_tile, lane_tile) near the byte budget, TPU-layout-legal.

    Legality: the channel tile is either a multiple of the dtype's packed
    sublane granularity or the full extent; the lane tile is either a multiple
    of 128 or the full extent. Ragged last blocks are handled by cdiv grids.
    """
    sublane = max(8, 32 // itemsize)          # 8 f32, 16 bf16, 32 int8/fp8
    row_bytes = 2 * lanes * itemsize          # one channel row, both halves
    max_ct = target_block_bytes // row_bytes

    if max_ct >= 1:
        if c_eff <= max_ct:
            ch_tile = c_eff                   # whole channel extent (always legal)
        else:
            ch_tile = min(c_eff, max(sublane, (max_ct // sublane) * sublane))
        lane_tile = lanes                     # full spatial extent (always legal)
    else:
        # Spatial axis alone exceeds the budget: thinnest legal channel tile,
        # tile the lane axis in multiples of 128.
        ch_tile = min(sublane, c_eff)
        max_lt = target_block_bytes // (2 * ch_tile * itemsize)
        lane_tile = min(lanes, max(128, (max_lt // 128) * 128))

    # v7x has two TensorCores; avoid a single-program grid when the problem can
    # be split along an alignment-preserving axis (no-op on v5e/v6e).
    if n == 1 and pl.cdiv(c_eff, ch_tile) == 1 and pl.cdiv(lanes, lane_tile) == 1:
        if c_eff >= 2 * sublane:
            half = -(-((c_eff + 1) // 2) // sublane) * sublane
            ch_tile = min(c_eff, half)
        elif lanes >= 256:
            half = -(-((lanes + 1) // 2) // 128) * 128
            lane_tile = min(lanes, half)

    return ch_tile, lane_tile


def householder_forward(z, theta, *, axis=1, target_block_bytes=4 << 20,
                        vmem_limit_bytes=48 << 20, donate_input=False):
    """Pallas implementation of HouseHolder.forward.

    Args:
      z: (N, C, H, W) array (NCHW, like the PyTorch module).
      theta: (1, C//2, 1, 1) parameter.
      axis: channel axis (only axis=1 supported, as in the default module).
    Returns:
      (N, C, H, W) array with the same dtype as `z`.
    """
    assert axis == 1, "only axis=1 (channel axis, NCHW) is supported"
    n, c, h, w = z.shape
    assert c % 2 == 0
    c_eff = c // 2
    lanes = h * w
    # TODO(synk): if H*W is far from a multiple of 128 (e.g. 7x7 maps), stores
    # are masked and lane bandwidth is wasted; fix the layout upstream rather
    # than padding here (padding would cost a full extra HBM pass).

    # Free, contiguous view: z[:, :c_eff] == z4[:, 0], z[:, c_eff:] == z4[:, 1].
    z4 = z.reshape(n, 2, c_eff, lanes)

    # Trig table always in float32 (tiny; avoids bf16 boundary/rotation error),
    # cast happens only at the final store inside the kernel.
    th = theta.reshape(c_eff).astype(jnp.float32)
    trig = jnp.stack(
        [jnp.sin(0.5 * th), jnp.cos(0.5 * th), jnp.sin(th), jnp.cos(th)],
        axis=-1,
    )  # (c_eff, 4) f32

    itemsize = jnp.dtype(z.dtype).itemsize
    ch_tile, lane_tile = _choose_tiles(n, c_eff, lanes, itemsize, target_block_bytes)
    grid_c = pl.cdiv(c_eff, ch_tile)
    grid_l = pl.cdiv(lanes, lane_tile)
    grid = (n, grid_c, grid_l)

    # Pad the trig table so the in-kernel dynamic slice of the ragged last
    # channel block never reads out of bounds.
    c_eff_pad = grid_c * ch_tile
    if c_eff_pad > c_eff:
        trig = jnp.pad(trig, ((0, c_eff_pad - c_eff), (0, 0)))

    data_spec = pl.BlockSpec((1, 2, ch_tile, lane_tile),
                             lambda i, j, l: (i, 0, j, l))
    trig_spec = pl.BlockSpec((c_eff_pad, 4), lambda i, j, l: (0, 0))  # resident

    kernel = functools.partial(_householder_kernel,
                               ch_tile=ch_tile,
                               single_c_block=(grid_c == 1))

    out4 = pl.pallas_call(
        kernel,
        grid=grid,
        in_specs=[data_spec, trig_spec],
        out_specs=data_spec,
        out_shape=jax.ShapeDtypeStruct((n, 2, c_eff, lanes), z.dtype),
        input_output_aliases={0: 0} if donate_input else {},
        compiler_params=pltpu.CompilerParams(
            dimension_semantics=("parallel", "parallel", "parallel"),
            vmem_limit_bytes=vmem_limit_bytes,  # usage ~4x block (<= ~16 MiB)
        ),
    )(z4, trig)

    # concat([a, b], axis=1) over (n, c_eff, h, w) halves IS this contiguous
    # layout, so the reshape back to NCHW is free.
    return out4.reshape(n, c, h, w)


def householder_reference(z, theta):
    """Pure-JAX reference mirroring the PyTorch forward exactly."""
    c = z.shape[1]
    x, y = z[:, : c // 2], z[:, c // 2:]
    selector = x * jnp.sin(0.5 * theta) - y * jnp.cos(0.5 * theta)
    a_2 = x * jnp.cos(theta) + y * jnp.sin(theta)
    b_2 = x * jnp.sin(theta) - y * jnp.cos(theta)
    a = x * (selector <= 0) + a_2 * (selector > 0)
    b = y * (selector <= 0) + b_2 * (selector > 0)
    return jnp.concatenate([a, b], axis=1) / SQRT_2


if __name__ == "__main__":
    key = jax.random.PRNGKey(0)
    N, C, H, W = 2, 4, 16, 16  # channels must be even

    z = jax.random.normal(key, (N, C, H, W), dtype=jnp.float32)
    # Deterministic parameter init, matching the PyTorch __init__:
    # theta = 0.5 * pi * ones(1, C//2, 1, 1)
    theta = 0.5 * jnp.pi * jnp.ones((1, C // 2, 1, 1), dtype=jnp.float32)

    out = jax.block_until_ready(householder_forward(z, theta))
    ref = householder_reference(z, theta)

    assert out.shape == z.shape and out.dtype == z.dtype
    assert jnp.allclose(out, ref, atol=1e-6, rtol=1e-5), float(
        jnp.max(jnp.abs(out - ref)))

    print("KERNEL_OK")
</pallas_src>

<mosaic_0001>
module attributes {stable_mosaic.version = 11 : i64} {
  func.func @_householder_kernel(%arg0: i32, %arg1: i32, %arg2: i32, %arg3: memref<1x2x2x256xf32, #tpu.memory_space<vmem>>, %arg4: memref<2x4xf32, #tpu.memory_space<vmem>>, %arg5: memref<1x2x2x256xf32, #tpu.memory_space<vmem>>) attributes {dimension_semantics = [#tpu.dimension_semantics<parallel>, #tpu.dimension_semantics<parallel>, #tpu.dimension_semantics<parallel>], iteration_bounds = array<i64: 2, 1, 1>, scalar_prefetch = 0 : i64, scratch_operands = 0 : i64, tpu.core_type = #tpu.core_type<tc>, window_params = [{transform_indices = @transform_0, window_bounds = array<i64: 1, 2, 2, 256>}, {pipeline_mode = #tpu.pipeline_mode<synchronous>, transform_indices = @transform_1, window_bounds = array<i64: 2, 4>}, {transform_indices = @transform_2, window_bounds = array<i64: 1, 2, 2, 256>}]} {
    %c0 = arith.constant 0 : index
    %c0_0 = arith.constant 0 : index
    %0 = vector.load %arg4[%c0, %c0_0] : memref<2x4xf32, #tpu.memory_space<vmem>>, vector<2x4xf32>
    %1 = vector.extract_strided_slice %0 {offsets = [0, 0], sizes = [2, 1], strides = [1, 1]} : vector<2x4xf32> to vector<2x1xf32>
    %2 = vector.extract_strided_slice %0 {offsets = [0, 1], sizes = [2, 1], strides = [1, 1]} : vector<2x4xf32> to vector<2x1xf32>
    %3 = vector.extract_strided_slice %0 {offsets = [0, 2], sizes = [2, 1], strides = [1, 1]} : vector<2x4xf32> to vector<2x1xf32>
    %4 = vector.extract_strided_slice %0 {offsets = [0, 3], sizes = [2, 1], strides = [1, 1]} : vector<2x4xf32> to vector<2x1xf32>
    %c0_1 = arith.constant 0 : index
    %c0_2 = arith.constant 0 : index
    %c0_3 = arith.constant 0 : index
    %c0_4 = arith.constant 0 : index
    %5 = vector.load %arg3[%c0_1, %c0_2, %c0_3, %c0_4] : memref<1x2x2x256xf32, #tpu.memory_space<vmem>>, vector<1x1x2x256xf32>
    %6 = vector.shape_cast %5 : vector<1x1x2x256xf32> to vector<2x256xf32>
    %c0_5 = arith.constant 0 : index
    %c1 = arith.constant 1 : index
    %c0_6 = arith.constant 0 : index
    %c0_7 = arith.constant 0 : index
    %7 = vector.load %arg3[%c0_5, %c1, %c0_6, %c0_7] : memref<1x2x2x256xf32, #tpu.memory_space<vmem>>, vector<1x1x2x256xf32>
    %8 = vector.shape_cast %7 : vector<1x1x2x256xf32> to vector<2x256xf32>
    %9 = vector.broadcast %1 : vector<2x1xf32> to vector<2x256xf32>
    %10 = arith.mulf %6, %9 : vector<2x256xf32>
    %11 = vector.broadcast %2 : vector<2x1xf32> to vector<2x256xf32>
    %12 = arith.mulf %8, %11 : vector<2x256xf32>
    %13 = arith.subf %10, %12 : vector<2x256xf32>
    %cst = arith.constant 0.000000e+00 : f32
    %14 = vector.broadcast %cst : f32 to vector<2x256xf32>
    %15 = arith.cmpf ole, %13, %14 : vector<2x256xf32>
    %16 = vector.broadcast %4 : vector<2x1xf32> to vector<2x256xf32>
    %17 = arith.mulf %6, %16 : vector<2x256xf32>
    %18 = vector.broadcast %3 : vector<2x1xf32> to vector<2x256xf32>
    %19 = arith.mulf %8, %18 : vector<2x256xf32>
    %20 = arith.addf %17, %19 : vector<2x256xf32>
    %21 = arith.select %15, %6, %20 : vector<2x256xi1>, vector<2x256xf32>
    %22 = vector.broadcast %3 : vector<2x1xf32> to vector<2x256xf32>
    %23 = arith.mulf %6, %22 : vector<2x256xf32>
    %24 = vector.broadcast %4 : vector<2x1xf32> to vector<2x256xf32>
    %25 = arith.mulf %8, %24 : vector<2x256xf32>
    %26 = arith.subf %23, %25 : vector<2x256xf32>
    %27 = arith.select %15, %8, %26 : vector<2x256xi1>, vector<2x256xf32>
    %cst_8 = arith.constant 0.707106769 : f32
    %28 = vector.broadcast %cst_8 : f32 to vector<2x256xf32>
    %29 = arith.mulf %21, %28 : vector<2x256xf32>
    %c0_9 = arith.constant 0 : index
    %c0_10 = arith.constant 0 : index
    %c0_11 = arith.constant 0 : index
    %c0_12 = arith.constant 0 : index
    %30 = vector.load %arg5[%c0_9, %c0_10, %c0_11, %c0_12] : memref<1x2x2x256xf32, #tpu.memory_space<vmem>>, vector<1x1x2x256xf32>
    %31 = vector.shape_cast %30 : vector<1x1x2x256xf32> to vector<2x256xf32>
    %32 = vector.shape_cast %29 : vector<2x256xf32> to vector<1x1x2x256xf32>
    tpu.vector_store %arg5[%c0_9, %c0_10, %c0_11, %c0_12], %32 {strides = array<i32>} : memref<1x2x2x256xf32, #tpu.memory_space<vmem>>, vector<1x1x2x256xf32>,
    %cst_13 = arith.constant 0.707106769 : f32
    %33 = vector.broadcast %cst_13 : f32 to vector<2x256xf32>
    %34 = arith.mulf %27, %33 : vector<2x256xf32>
    %c0_14 = arith.constant 0 : index
    %c1_15 = arith.constant 1 : index
    %c0_16 = arith.constant 0 : index
    %c0_17 = arith.constant 0 : index
    %35 = vector.load %arg5[%c0_14, %c1_15, %c0_16, %c0_17] : memref<1x2x2x256xf32, #tpu.memory_space<vmem>>, vector<1x1x2x256xf32>
    %36 = vector.shape_cast %35 : vector<1x1x2x256xf32> to vector<2x256xf32>
    %37 = vector.shape_cast %34 : vector<2x256xf32> to vector<1x1x2x256xf32>
    tpu.vector_store %arg5[%c0_14, %c1_15, %c0_16, %c0_17], %37 {strides = array<i32>} : memref<1x2x2x256xf32, #tpu.memory_space<vmem>>, vector<1x1x2x256xf32>,
    return
  }
  func.func @transform_0(%arg0: i32, %arg1: i32, %arg2: i32) -> (i32, i32, i32, i32) {
    %c0_i32 = arith.constant 0 : i32
    %c0_i32_0 = arith.constant 0 : i32
    return %arg0, %c0_i32, %arg1, %arg2 : i32, i32, i32, i32
  }
  func.func @transform_1(%arg0: i32, %arg1: i32, %arg2: i32) -> (i32, i32) {
    %c0_i32 = arith.constant 0 : i32
    %c0_i32_0 = arith.constant 0 : i32
    %c0_i32_1 = arith.constant 0 : i32
    return %c0_i32, %c0_i32_0 : i32, i32
  }
  func.func @transform_2(%arg0: i32, %arg1: i32, %arg2: i32) -> (i32, i32, i32, i32) {
    %c0_i32 = arith.constant 0 : i32
    %c0_i32_0 = arith.constant 0 : i32
    return %arg0, %c0_i32, %arg1, %arg2 : i32, i32, i32, i32
  }
}

</mosaic_0001>

<bundles_post_ra>
// kernel: tpu_custom_call.1
= control target key start
LH: loop header
LB: loop body
LE: loop exit
PB: predicated region body
PF: predicated region fallthrough
CT: control target
= control target key end

     0   :  { %7 = vsyncpa [#allocation3], 0  ;;  %s826_s0 = inlined_call_operand.hbm [shape: f32[2,2,2,256], index: 0, kind: input, shape index: {}]   ;;  %s827_s1 = inlined_call_operand.hbm [shape: f32[2,4], index: 1, kind: input, shape index: {}]   ;;  %s828_s2 = inlined_call_operand.hbm [shape: f32[2,2,2,256], index: 2, kind: output, shape index: {}]  }
   0x1   :  { %9 = vsyncpa [#allocation3 + $0x1], 0 }
   0x2   :  { %10 = vsyncpa [#allocation6], 0 }
   0x3   :  { %11 = vsyncpa [#allocation4], 0 }
   0x4   :  { %13 = vsyncpa [#allocation4 + $0x1], 0  ;;  %s671_s9 = smov 0   ;;  %s673_s10 = smov 0  }
   0x5   :  { %s675_s11 = smov 0   ;;  %s677_s12 = smov 0  }
   0x6   :  { %s679_s13 = smov 0   ;;  %s681_s14 = smov 0  }
   0x7 LB: > { %s390_s15 = sadd.s32 4294967295, %s644_s14   ;;  %s391_s16 = sadd.s32 4294967294, %s644_s14   ;;  %s644_s14 = sphi %s681_s14, %s19_s14   ;;  %s640_s13 = sphi %s679_s13, %s840_s13   ;;  %s636_s12 = sphi %s677_s12, %s839_s12   ;;  %s632_s11 = sphi %s675_s11, %s838_s11   ;;  %s628_s10 = sphi %s673_s10, %s837_s10   ;;  %s624_s9 = sphi %s671_s9, %s836_s9  }
   0x8   : > { %s49_s17 = sadd.s32 1, %s632_s11  ;;  %p56_p0 = scmp.ne.s32.totalorder %s632_s11, %s628_s10 }
   0x9   : > { %p57_p1 = scmp.eq.s32.totalorder %s644_s14, 0  ;;  %p62_p2 = scmp.ne.s32.totalorder %s628_s10, %s624_s9 }
   0xa   : > { %p709_p3 = scmp.eq.s32.totalorder %s390_s15, 0  ;;  %p111_p4 = scmp.eq.s32.totalorder %s390_s15, 1 }
   0xb   : > { %p713_p5 = por %p57_p1, %p56_p0  ;;  %p117_p6 = scmp.eq.s32.totalorder %s391_s16, 1 }
   0xc   : > { %p719_p7 = por %p709_p3, %p62_p2  ;;  %p723_p8 = por %p111_p4, %p56_p0 }
   0xd   : > { %p727_p9 = por %p117_p6, %p62_p2  ;;  %p392_p10 = scmp.ge.s32.totalorder %s644_s14, 1 }
   0xe   : > { %p124_p11 = scmp.lt.s32.totalorder %s644_s14, 3  ;;  %s136_s25 = sshll.u32 %s827_s1, 4  ;;  %s137_s25 = int_to_ptr.hbm [resolvable:$true] %s136_s25 }
   0xf   : > { %s646_s27 = smov [#allocation5]   ;;  %p394_p13 = scmp.ge.s32.totalorder %s644_s14, 2 }
  0x10   : > { %p736_p12 = pnand %p392_p10, %p124_p11  ;;  %s138_s28 = sshll.u32 %s646_s27, 4  ;;  %s139_s28 = int_to_ptr.vmem [resolvable:$true] %s138_s28 }
  0x11   : > { %p432_p1 = scmp.lt.s32.totalorder %s644_s14, 2  ;;  %s38_s30 = sadd.s32 1, %s640_s13 }
  0x12   : > { %p419_p0 = pneg %p736_p12  ;;  %p40_p6 = scmp.ge.s32.totalorder %s38_s30, 2 }
  0x13   : > { %p748_p4 = pnand %p432_p1, %p713_p5  ;;  %s149_s3 = sand.u32 1, %s632_s11  }
  0x14   : > { %p420_p2 = pnand %p419_p0, %p709_p3  ;;  %s842_s30 = smov (%p40_p6, %s38_s30), 0 }
  0x15   : > { %s395_s4 = sshll.u32 %s149_s3, 3  ;;  %s42_s5 = ssub.s32 %s640_s13, %s842_s30 }
  0x16   : > { %422 = dma.hbm_to_vmem [thread:$0]  (!%p420_p2), %s137_s25, 32, %s139_s28, [#allocation6]  }
  0x17   : > { %p47_p10 = scmp.eq.s32.totalorder %s42_s5, 0  ;;  %s409_s6 = sshll.u32 %s640_s13, 3 }
  0x18   : > { %s162_s15 = scalar_lea.hbm %s826_s0, %s409_s6  ;;  %s153_s16 = scalar_lea.vmem [#allocation2], %s395_s4 }
  0x19   : > { %s165_s19 = sshll.u32 %s153_s16, 4  ;;  %s163_s24 = sshll.u32 %s162_s15, 4  ;;  %s166_s19 = int_to_ptr.vmem [resolvable:$true] %s165_s19  ;;  %s164_s24 = int_to_ptr.hbm [resolvable:$true] %s163_s24 }
  0x1a   : > { %s765_s23 = scalar_select %p47_p10, %s632_s11, %s49_s17  }
  0x1b   : > { %s150_s25 = scalar_lea.sflag [#allocation3], %s149_s3  ;;  %s647_s27 = smov 64  }
  0x1c   : > { %s648_s28 = smov 4   ;;  %177 = sbr.rel (%p736_p12) target bundleno = 177 (0xb1), region = 28 }
  0x1d   : > { %426 = dma.hbm_to_vmem [thread:$0]  (!%p748_p4), %s164_s24, 128, %s166_s19, %s150_s25, %s647_s27, %s647_s27, %s648_s28  }
  0x1e   : > { %s772_s5 = sand.u32 (!%p736_p12), 1, %s628_s10  }
  0x1f   : > { %s399_s17 = sshll.u32 (!%p736_p12), %s772_s5, 3  ;;  %s180_s4 = scalar_lea.sflag (!%p736_p12), [#allocation3], %s772_s5 }
  0x20   : > { %s183_s6 = scalar_lea.vmem (!%p736_p12), [#allocation2], %s399_s17 }
  0x21   : > { %611 = dma.done.wait (%p719_p7), %s180_s4, 128  }
  0x22   : > { %613 = vsyncadd (%p719_p7), %s180_s4, 4294967168 }
  0x23   : > { %615 = dma.done.wait (%p709_p3), [#allocation6], 32  }
  0x24   : > { %617 = vsyncadd (%p709_p3), [#allocation6], 4294967264  ;;  %v649_v0 = vmov 3   ;;  %v650_v1 = vmov 0   ;;  %v212_v2 = vld [vmem:[#allocation5] sm:$0x3] }
  0x25   : > { %495 = vset.pattern.permute.xlu1 %v649_v0  ;;  %493 = vset.pattern.permute.xlu0 %v650_v1  ;;  %v651_v3 = vmov 2   ;;  %v652_v4 = vmov 1   ;;  %v653_v5 = vmov 269488144   ;;  %v213_v12 = vld [vmem:[%s183_s6] sm:$0xf] }
  0x26   : > { %238 = vperm.xlu1 %495, %v212_v2   ;;  %218 = vperm.xlu0 %493, %v212_v2   ;;  %v221_v6 = vunpack.c.l.s4 %v653_v5  ;;  %v402_v13 = vld [vmem:[%s183_s6 + $0x4] sm:$0xf]  ;;  %s410_s18 = sshll.u32 %s636_s12, 3  ;;  %s209_s3 = scalar_lea.vmem [#allocation7], %s399_s17 }
  0x27   : > { %s282_s29 = scalar_lea.hbm %s828_s2, %s410_s18  ;;  %s283_s7 = sshll.u32 %s209_s3, 4  ;;  %s284_s7 = int_to_ptr.vmem [resolvable:$true] %s283_s7 }
  0x28   : > { %v222_v9 = vunpack.c.0.s8 %v221_v6  ;;  %s285_s12 = sshll.u32 %s282_s29, 4  ;;  %s267_s8 = scalar_lea.sflag [#allocation4], %s772_s5  ;;  %s286_s12 = int_to_ptr.hbm [resolvable:$true] %s285_s12 }
  0x29   : > { %s572_s15 = sshra.s32 %s286_s12, 4  ;;  %s578_s25 = scalar_lea.hbm %s828_s2, 16  ;;  %s573_s15 = int_to_ptr.hbm [resolvable:$true] %s572_s15 }
  0x2a   : > { %s574_s16 = scalar_lea.hbm %s573_s15, 8  ;;  %p579_p11 = scmp.lt.s32.totalorder %s573_s15, %s828_s2 }
  0x2b   : > { %p575_p3 = scmp.ne.s32.totalorder %s573_s15, %s574_s16  ;;  %p580_p12 = scmp.lt.s32.totalorder %s578_s25, %s574_s16 }
  0x2d   : > { %p576_p5 = pnand %p575_p3, %p723_p8  ;;  %p581_p0 = por %p580_p12, %p579_p11 }
  0x2e   : > { %496 = vset.pattern.permute.xlu1 %v651_v3  ;;  %494 = vset.pattern.permute.xlu0 %v652_v4 }
  0x2f   : > { %247 = vperm.xlu1 %496, %v212_v2   ;;  %227 = vperm.xlu0 %494, %v212_v2   ;;  %p577_p7 = pneg %p576_p5 }
  0x31   : > { %p582_p1 = pnand %p581_p0, %p577_p7 }
  0x37   : > { %497 = vset.pattern.permute.xlu0 %v651_v3 }
  0x98   : > { %v219_v7 = vpop.permute.xlu0 %218  ;;  %v239_v8 = vpop.permute.xlu1 %238 }
  0x99   : > { %v223_v10 = vperm.slane %v219_v7, %v222_v9  ;;  %v243_v11 = vperm.slane %v239_v8, %v222_v9 }
  0x9b   : > { %v225_v18 = vmul.f32 %v223_v10, %v213_v12  ;;  %v245_v19 = vmul.f32 %v243_v11, %v213_v12  ;;  %v258_v20 = vmul.f32 %v402_v13, %v243_v11 }
  0xa1   : > { %v248_v14 = vpop.permute.xlu1 %247  ;;  %v228_v15 = vpop.permute.xlu0 %227 }
  0xa2   : > { %v252_v16 = vperm.slane %v248_v14, %v222_v9  ;;  %v232_v17 = vperm.slane %v228_v15, %v222_v9 }
  0xa4   : > { %v254_v21 = vmul.f32 %v402_v13, %v252_v16  ;;  %v257_v22 = vmul.f32 %v252_v16, %v213_v12  ;;  %v234_v23 = vmul.f32 %v402_v13, %v232_v17 }
  0xa6   : > { %v255_v24 = vadd.f32 %v254_v21, %v245_v19  ;;  %v259_v25 = vsub.f32 %v257_v22, %v258_v20  ;;  %v235_v26 = vsub.f32 %v225_v18, %v234_v23 }
  0xa8   : > { %vm236_vm0 = vcmp.le.f32.partialorder %v235_v26, 0.0 }
  0xa9   : > { %v256_v27 = vsel %vm236_vm0, %v213_v12, %v255_v24  ;;  %v260_v28 = vsel %vm236_vm0, %v402_v13, %v259_v25 }
  0xaa   : > { %v261_v29 = vmul.f32 0.70710677, %v256_v27  ;;  %v263_v30 = vmul.f32 0.70710677, %v260_v28 }
  0xac   : > { %262 = vst [vmem:[%s209_s3] sm:$0xf] %v261_v29 }
  0xad   : > { %403 = vst [vmem:[%s209_s3 + $0x4] sm:$0xf] %v263_v30 }
  0xae   : > { %585 = shalt.err (!%p582_p1)
}
  0xaf   : > { %s654_s5 = smov 64   ;;  %s655_s17 = smov 4  }
  0xb0   : > { %417 = dma.vmem_to_hbm [thread:$0]  (%p723_p8), %s284_s7, 128, %s286_s12, %s267_s8, %s654_s5, %s654_s5, %s655_s17  }
  0xb1 PF: > { %s300_s4 = sand.u32 1, %s624_s9   ;;  %p428_p2 = pnand %p394_p13, %p727_p9 }
  0xb2   : > { %s301_s6 = scalar_lea.sflag [#allocation4], %s300_s4 }
  0xb3   : > { %p429_p4 = pneg %p428_p2 }
  0xb5   : > { %619 = dma.done.wait (%p429_p4), %s301_s6, 128  }
  0xb6   : > { %621 = vsyncadd (%p429_p4), %s301_s6, 4294967168  ;;  %s19_s14 = sadd.s32 1, %s644_s14   ;;  %s836_s9 = smov %s628_s10 }
  0xb7   : > { %p16_p6 = scmp.ge.s32.totalorder %s19_s14, 4   ;;  %s837_s10 = smov %s632_s11 }
  0xb8   : > { %s838_s11 = smov %s765_s23  ;;  %s839_s12 = smov %s640_s13 }
  0xb9   : > { %s840_s13 = smov %s842_s30  ;;  %18 = sbr.rel (!%p16_p6) target bundleno = 7 (0x7), region = 79 }
  0xbe   :  { %307 = vsyncpa [#allocation3], 1 }
  0xbf   :  { %309 = vsyncpa [#allocation3 + $0x1], 1 }
  0xc0   :  { %310 = vsyncpa [#allocation6], 1 }
  0xc1   :  { %311 = vsyncpa [#allocation4], 1 }
  0xc2   :  { %313 = vsyncpa [#allocation4 + $0x1], 1 }

</bundles_post_ra>
